<compile_context>
chip_gen: v7x
topology: tpu7x:2x2x1
jax: 0.10.0
libtpu: 0.0.40
codegen_flags: <defaults>
</compile_context>

<pallas_src>
import numpy as np
import jax
import jax.numpy as jnp
from jax.experimental import pallas as pl
from jax.experimental.pallas import tpu as pltpu

# ---- "config" values (configparser in the original; fixed deterministically here) ----
N_QUBITS = 4
Q_DEPTH = 6
Q_DELTA = 0.01
DIM = 2 ** N_QUBITS          # 16 statevector amplitudes
IN_FEATURES = 512
OUT_FEATURES = 2


# ----------------------------- Pallas kernel ------------------------------------
def dressed_qnet_kernel(x_ref, wpre_ref, bpre_ref, sgn_ref, upostT_ref,
                        m_ref, bpost_ref, o_ref):
    """One batch tile: pre_net -> tanh*pi/2 -> product state -> U_post -> fused Z/post_net."""
    x = x_ref[...].astype(jnp.float32)                        # (Bb, 512)  bf16 -> f32

    # pre_net + per-qubit amplitude of RY(theta) H |0>, entirely on VPU/XLU/EUP.
    #   amp_i(bit) = cos(t/2) + sin(t/2) * (2*bit - 1)     (1/sqrt(2) folded into u_post)
    psi = None
    for i in range(N_QUBITS):                                 # static unroll (n is tiny)
        w_i = wpre_ref[i:i + 1, :]                            # (1, 512) lane-major row
        pre_i = (jnp.sum(x * w_i, axis=-1, keepdims=True)
                 + bpre_ref[0:1, i:i + 1])                    # (Bb, 1)
        half = jnp.tanh(pre_i) * np.float32(np.pi / 4.0)      # = (tanh(pre)*pi/2) / 2
        amp_i = jnp.cos(half) + jnp.sin(half) * sgn_ref[i:i + 1, :]   # (Bb, 16)
        psi = amp_i if psi is None else psi * amp_i           # product state

    # constant post-unitary (normalization pre-folded), square, fused Z-sign + post_net
    psi_f = jnp.dot(psi, upostT_ref[...], preferred_element_type=jnp.float32)   # (Bb, 16)
    probs = psi_f * psi_f
    o_ref[...] = (jnp.dot(probs, m_ref[...], preferred_element_type=jnp.float32)
                  + bpost_ref[...])                           # (Bb, 2)


# ----------------------------- wrapper / host setup ------------------------------
def dressed_quantum_net(x, w_pre, b_pre, q_params, w_post, b_post, *, block_b=1024):
    """x: (B, 512) float32.  Returns (B, 2) float32."""
    B = x.shape[0]
    qw = np.asarray(q_params, dtype=np.float64).reshape(Q_DEPTH, N_QUBITS)

    # ---- constant circuit matrices (parameter setup, plain numpy) ----
    def ry_mat(th):
        c, s = np.cos(th / 2.0), np.sin(th / 2.0)
        return np.array([[c, -s], [s, c]], dtype=np.float64)

    def kron_all(mats):
        out = np.array([[1.0]])
        for m in mats:
            out = np.kron(out, m)
        return out

    def cnot_matrix(n, ctrl, tgt):
        d = 2 ** n
        M = np.zeros((d, d))
        for z in range(d):
            bc = (z >> (n - 1 - ctrl)) & 1
            z2 = z ^ ((1 << (n - 1 - tgt)) if bc else 0)
            M[z2, z] = 1.0
        return M

    ent = np.eye(DIM)
    for i in range(0, N_QUBITS - 1, 2):
        ent = cnot_matrix(N_QUBITS, i, i + 1) @ ent
    for i in range(1, N_QUBITS - 1, 2):
        ent = cnot_matrix(N_QUBITS, i, i + 1) @ ent

    u_post = np.eye(DIM)
    for k in range(Q_DEPTH):
        ry_layer = kron_all([ry_mat(qw[k, i]) for i in range(N_QUBITS)])
        u_post = ry_layer @ ent @ u_post

    # bits[i, z] = wire-i bit of basis state z (wire 0 = most significant, PennyLane order)
    bits = np.zeros((N_QUBITS, DIM), dtype=np.float64)
    for i in range(N_QUBITS):
        for z in range(DIM):
            bits[i, z] = (z >> (N_QUBITS - 1 - i)) & 1
    sgn = 2.0 * bits - 1.0                                    # (n, 16)  +/-1 amp selector
    zsignT = 1.0 - 2.0 * bits.T                               # (16, n)  <Z_i> signs

    # host-side constant folding
    upostT_scaled = (u_post * (2.0 ** (-N_QUBITS / 2.0))).T           # (16, 16)
    m_fused = zsignT @ np.asarray(w_post, dtype=np.float64).T         # (16, 2)

    # ---- batch tiling (block must be a multiple of 8 unless it equals B) ----
    if B <= block_b:
        bb, Bp = B, B
    else:
        bb = block_b
        Bp = -(-B // bb) * bb
    x_bf = jnp.asarray(x, dtype=jnp.bfloat16)                 # halve the dominant DMA
    if Bp != B:
        x_bf = jnp.pad(x_bf, ((0, Bp - B), (0, 0)))
    nb = Bp // bb

    args = (
        x_bf,                                                            # (Bp, 512) bf16
        jnp.asarray(w_pre, dtype=jnp.float32),                           # (4, 512) lane-major
        jnp.asarray(np.asarray(b_pre).reshape(1, N_QUBITS), dtype=jnp.float32),
        jnp.asarray(sgn, dtype=jnp.float32),                             # (4, 16)
        jnp.asarray(upostT_scaled, dtype=jnp.float32),                   # (16, 16)
        jnp.asarray(m_fused, dtype=jnp.float32),                         # (16, 2)
        jnp.asarray(np.asarray(b_post).reshape(1, OUT_FEATURES), dtype=jnp.float32),
    )

    in_specs = [
        pl.BlockSpec((bb, IN_FEATURES), lambda i: (i, 0)),               # batch-tiled x
        pl.BlockSpec((N_QUBITS, IN_FEATURES), lambda i: (0, 0)),         # constants: resident
        pl.BlockSpec((1, N_QUBITS), lambda i: (0, 0)),
        pl.BlockSpec((N_QUBITS, DIM), lambda i: (0, 0)),
        pl.BlockSpec((DIM, DIM), lambda i: (0, 0)),
        pl.BlockSpec((DIM, OUT_FEATURES), lambda i: (0, 0)),
        pl.BlockSpec((1, OUT_FEATURES), lambda i: (0, 0)),
    ]

    const_bytes = sum(int(np.prod(a.shape)) * a.dtype.itemsize for a in args[1:])
    cost = pl.CostEstimate(
        flops=2 * Bp * (IN_FEATURES * N_QUBITS + DIM * DIM + DIM * OUT_FEATURES),
        transcendentals=3 * Bp * N_QUBITS,
        bytes_accessed=Bp * IN_FEATURES * 2 + Bp * OUT_FEATURES * 4 + const_bytes,
    )

    out = pl.pallas_call(
        dressed_qnet_kernel,
        out_shape=jax.ShapeDtypeStruct((Bp, OUT_FEATURES), jnp.float32),
        grid=(nb,),
        in_specs=in_specs,
        out_specs=pl.BlockSpec((bb, OUT_FEATURES), lambda i: (i, 0)),
        compiler_params=pltpu.CompilerParams(dimension_semantics=("parallel",)),
        cost_estimate=cost,
    )(*args)
    return out[:B] if Bp != B else out


# ----------------------------- pure-numpy reference ------------------------------
def _ref_quantum_net(q_in_vec, qw):
    n = N_QUBITS
    state = np.zeros(2 ** n)
    state[0] = 1.0

    def apply_1q(st, gate, wire):
        t = st.reshape((2,) * n)
        t = np.tensordot(gate, t, axes=([1], [wire]))
        t = np.moveaxis(t, 0, wire)
        return t.reshape(-1)

    def apply_cnot(st, c, t):
        a = st.reshape((2,) * n).copy()
        idx = [slice(None)] * n
        idx[c] = 1
        t_ax = t - (1 if t > c else 0)
        a[tuple(idx)] = np.flip(a[tuple(idx)], axis=t_ax)
        return a.reshape(-1)

    H = np.array([[1, 1], [1, -1]]) / np.sqrt(2)

    def RY(th):
        return np.array([[np.cos(th / 2), -np.sin(th / 2)],
                         [np.sin(th / 2), np.cos(th / 2)]])

    for i in range(n):
        state = apply_1q(state, H, i)
    for i in range(n):
        state = apply_1q(state, RY(q_in_vec[i]), i)
    for k in range(Q_DEPTH):
        for i in range(0, n - 1, 2):
            state = apply_cnot(state, i, i + 1)
        for i in range(1, n - 1, 2):
            state = apply_cnot(state, i, i + 1)
        for i in range(n):
            state = apply_1q(state, RY(qw[k, i]), i)

    probs = (state ** 2).reshape((2,) * n)
    expz = []
    for i in range(n):
        p = probs.sum(axis=tuple(j for j in range(n) if j != i))
        expz.append(p[0] - p[1])
    return np.array(expz)


def _ref_forward(x, w_pre, b_pre, q_params, w_post, b_post):
    x = np.asarray(x, dtype=np.float64)
    pre = x @ np.asarray(w_pre, dtype=np.float64).T + np.asarray(b_pre, dtype=np.float64)
    q_in = np.tanh(pre) * np.pi / 2.0
    qw = np.asarray(q_params, dtype=np.float64).reshape(Q_DEPTH, N_QUBITS)
    q_out = np.stack([_ref_quantum_net(q_in[b], qw) for b in range(x.shape[0])])
    return q_out @ np.asarray(w_post, dtype=np.float64).T + np.asarray(b_post, dtype=np.float64)


# --------------------------------- main -----------------------------------------
if __name__ == "__main__":
    key = jax.random.PRNGKey(0)
    k_x, k_wpre, k_bpre, k_q, k_wpost, k_bpost = jax.random.split(key, 6)

    B = 8
    x = jax.random.normal(k_x, (B, IN_FEATURES), dtype=jnp.float32)

    # deterministic parameter init (shapes from the module's __init__)
    lim_pre = 1.0 / np.sqrt(IN_FEATURES)
    w_pre = jax.random.uniform(k_wpre, (N_QUBITS, IN_FEATURES),
                               minval=-lim_pre, maxval=lim_pre, dtype=jnp.float32)
    b_pre = jax.random.uniform(k_bpre, (N_QUBITS,),
                               minval=-lim_pre, maxval=lim_pre, dtype=jnp.float32)
    q_params = Q_DELTA * jax.random.normal(k_q, (Q_DEPTH * N_QUBITS,), dtype=jnp.float32)
    lim_post = 1.0 / np.sqrt(N_QUBITS)
    w_post = jax.random.uniform(k_wpost, (OUT_FEATURES, N_QUBITS),
                                minval=-lim_post, maxval=lim_post, dtype=jnp.float32)
    b_post = jax.random.uniform(k_bpost, (OUT_FEATURES,),
                                minval=-lim_post, maxval=lim_post, dtype=jnp.float32)

    out = dressed_quantum_net(x, w_pre, b_pre, q_params, w_post, b_post)
    out = jax.block_until_ready(out)

    # reference uses the same bf16-rounded activations the kernel consumes
    x_ref_in = np.asarray(jnp.asarray(x, jnp.bfloat16).astype(jnp.float32))
    ref = _ref_forward(x_ref_in, np.asarray(w_pre), np.asarray(b_pre),
                       np.asarray(q_params), np.asarray(w_post), np.asarray(b_post))
    np.testing.assert_allclose(np.asarray(out), ref, rtol=2e-4, atol=2e-4)

    print("KERNEL_OK")
</pallas_src>

<mosaic_0001>
module attributes {stable_mosaic.version = 11 : i64} {
  func.func @dressed_qnet_kernel(%arg0: i32, %arg1: memref<8x512xbf16, #tpu.memory_space<vmem>>, %arg2: memref<4x512xf32, #tpu.memory_space<vmem>>, %arg3: memref<1x4xf32, #tpu.memory_space<vmem>>, %arg4: memref<4x16xf32, #tpu.memory_space<vmem>>, %arg5: memref<16x16xf32, #tpu.memory_space<vmem>>, %arg6: memref<16x2xf32, #tpu.memory_space<vmem>>, %arg7: memref<1x2xf32, #tpu.memory_space<vmem>>, %arg8: memref<8x2xf32, #tpu.memory_space<vmem>>) attributes {dimension_semantics = [#tpu.dimension_semantics<parallel>], iteration_bounds = array<i64: 1>, scalar_prefetch = 0 : i64, scratch_operands = 0 : i64, tpu.core_type = #tpu.core_type<tc>, window_params = [{transform_indices = @transform_0, window_bounds = array<i64: 8, 512>}, {pipeline_mode = #tpu.pipeline_mode<synchronous>, transform_indices = @transform_1, window_bounds = array<i64: 4, 512>}, {pipeline_mode = #tpu.pipeline_mode<synchronous>, transform_indices = @transform_2, window_bounds = array<i64: 1, 4>}, {pipeline_mode = #tpu.pipeline_mode<synchronous>, transform_indices = @transform_3, window_bounds = array<i64: 4, 16>}, {pipeline_mode = #tpu.pipeline_mode<synchronous>, transform_indices = @transform_4, window_bounds = array<i64: 16, 16>}, {pipeline_mode = #tpu.pipeline_mode<synchronous>, transform_indices = @transform_5, window_bounds = array<i64: 16, 2>}, {pipeline_mode = #tpu.pipeline_mode<synchronous>, transform_indices = @transform_6, window_bounds = array<i64: 1, 2>}, {transform_indices = @transform_7, window_bounds = array<i64: 8, 2>}]} {
    %c0 = arith.constant 0 : index
    %c0_0 = arith.constant 0 : index
    %0 = vector.load %arg1[%c0, %c0_0] : memref<8x512xbf16, #tpu.memory_space<vmem>>, vector<8x512xbf16>
    %1 = arith.extf %0 : vector<8x512xbf16> to vector<8x512xf32>
    %c0_1 = arith.constant 0 : index
    %c0_2 = arith.constant 0 : index
    %2 = vector.load %arg2[%c0_1, %c0_2] : memref<4x512xf32, #tpu.memory_space<vmem>>, vector<1x512xf32>
    %3 = vector.broadcast %2 : vector<1x512xf32> to vector<8x512xf32>
    %4 = arith.mulf %1, %3 : vector<8x512xf32>
    %cst = arith.constant dense<0.000000e+00> : vector<8xf32>
    %5 = vector.multi_reduction <add>, %4, %cst [1] : vector<8x512xf32> to vector<8xf32>
    %6 = vector.shape_cast %5 : vector<8xf32> to vector<8x1xf32>
    %c0_3 = arith.constant 0 : index
    %c0_4 = arith.constant 0 : index
    %7 = vector.load %arg3[%c0_3, %c0_4] : memref<1x4xf32, #tpu.memory_space<vmem>>, vector<1x1xf32>
    %8 = vector.broadcast %7 : vector<1x1xf32> to vector<8x1xf32>
    %9 = arith.addf %6, %8 : vector<8x1xf32>
    %10 = math.tanh %9 : vector<8x1xf32>
    %cst_5 = arith.constant 0.785398185 : f32
    %11 = vector.broadcast %cst_5 : f32 to vector<8x1xf32>
    %12 = arith.mulf %10, %11 : vector<8x1xf32>
    %13 = math.cos %12 : vector<8x1xf32>
    %14 = math.sin %12 : vector<8x1xf32>
    %c0_6 = arith.constant 0 : index
    %c0_7 = arith.constant 0 : index
    %15 = vector.load %arg4[%c0_6, %c0_7] : memref<4x16xf32, #tpu.memory_space<vmem>>, vector<1x16xf32>
    %16 = vector.broadcast %14 : vector<8x1xf32> to vector<8x16xf32>
    %17 = vector.broadcast %15 : vector<1x16xf32> to vector<8x16xf32>
    %18 = arith.mulf %16, %17 : vector<8x16xf32>
    %19 = vector.broadcast %13 : vector<8x1xf32> to vector<8x16xf32>
    %20 = arith.addf %19, %18 : vector<8x16xf32>
    %c1 = arith.constant 1 : index
    %c0_8 = arith.constant 0 : index
    %21 = vector.load %arg2[%c1, %c0_8] : memref<4x512xf32, #tpu.memory_space<vmem>>, vector<1x512xf32>
    %22 = vector.broadcast %21 : vector<1x512xf32> to vector<8x512xf32>
    %23 = arith.mulf %1, %22 : vector<8x512xf32>
    %cst_9 = arith.constant dense<0.000000e+00> : vector<8xf32>
    %24 = vector.multi_reduction <add>, %23, %cst_9 [1] : vector<8x512xf32> to vector<8xf32>
    %25 = vector.shape_cast %24 : vector<8xf32> to vector<8x1xf32>
    %c0_10 = arith.constant 0 : index
    %c1_11 = arith.constant 1 : index
    %26 = vector.load %arg3[%c0_10, %c1_11] : memref<1x4xf32, #tpu.memory_space<vmem>>, vector<1x1xf32>
    %27 = vector.broadcast %26 : vector<1x1xf32> to vector<8x1xf32>
    %28 = arith.addf %25, %27 : vector<8x1xf32>
    %29 = math.tanh %28 : vector<8x1xf32>
    %cst_12 = arith.constant 0.785398185 : f32
    %30 = vector.broadcast %cst_12 : f32 to vector<8x1xf32>
    %31 = arith.mulf %29, %30 : vector<8x1xf32>
    %32 = math.cos %31 : vector<8x1xf32>
    %33 = math.sin %31 : vector<8x1xf32>
    %c1_13 = arith.constant 1 : index
    %c0_14 = arith.constant 0 : index
    %34 = vector.load %arg4[%c1_13, %c0_14] : memref<4x16xf32, #tpu.memory_space<vmem>>, vector<1x16xf32>
    %35 = vector.broadcast %33 : vector<8x1xf32> to vector<8x16xf32>
    %36 = vector.broadcast %34 : vector<1x16xf32> to vector<8x16xf32>
    %37 = arith.mulf %35, %36 : vector<8x16xf32>
    %38 = vector.broadcast %32 : vector<8x1xf32> to vector<8x16xf32>
    %39 = arith.addf %38, %37 : vector<8x16xf32>
    %40 = arith.mulf %20, %39 : vector<8x16xf32>
    %c2 = arith.constant 2 : index
    %c0_15 = arith.constant 0 : index
    %41 = vector.load %arg2[%c2, %c0_15] : memref<4x512xf32, #tpu.memory_space<vmem>>, vector<1x512xf32>
    %42 = vector.broadcast %41 : vector<1x512xf32> to vector<8x512xf32>
    %43 = arith.mulf %1, %42 : vector<8x512xf32>
    %cst_16 = arith.constant dense<0.000000e+00> : vector<8xf32>
    %44 = vector.multi_reduction <add>, %43, %cst_16 [1] : vector<8x512xf32> to vector<8xf32>
    %45 = vector.shape_cast %44 : vector<8xf32> to vector<8x1xf32>
    %c0_17 = arith.constant 0 : index
    %c2_18 = arith.constant 2 : index
    %46 = vector.load %arg3[%c0_17, %c2_18] : memref<1x4xf32, #tpu.memory_space<vmem>>, vector<1x1xf32>
    %47 = vector.broadcast %46 : vector<1x1xf32> to vector<8x1xf32>
    %48 = arith.addf %45, %47 : vector<8x1xf32>
    %49 = math.tanh %48 : vector<8x1xf32>
    %cst_19 = arith.constant 0.785398185 : f32
    %50 = vector.broadcast %cst_19 : f32 to vector<8x1xf32>
    %51 = arith.mulf %49, %50 : vector<8x1xf32>
    %52 = math.cos %51 : vector<8x1xf32>
    %53 = math.sin %51 : vector<8x1xf32>
    %c2_20 = arith.constant 2 : index
    %c0_21 = arith.constant 0 : index
    %54 = vector.load %arg4[%c2_20, %c0_21] : memref<4x16xf32, #tpu.memory_space<vmem>>, vector<1x16xf32>
    %55 = vector.broadcast %53 : vector<8x1xf32> to vector<8x16xf32>
    %56 = vector.broadcast %54 : vector<1x16xf32> to vector<8x16xf32>
    %57 = arith.mulf %55, %56 : vector<8x16xf32>
    %58 = vector.broadcast %52 : vector<8x1xf32> to vector<8x16xf32>
    %59 = arith.addf %58, %57 : vector<8x16xf32>
    %60 = arith.mulf %40, %59 : vector<8x16xf32>
    %c3 = arith.constant 3 : index
    %c0_22 = arith.constant 0 : index
    %61 = vector.load %arg2[%c3, %c0_22] : memref<4x512xf32, #tpu.memory_space<vmem>>, vector<1x512xf32>
    %62 = vector.broadcast %61 : vector<1x512xf32> to vector<8x512xf32>
    %63 = arith.mulf %1, %62 : vector<8x512xf32>
    %cst_23 = arith.constant dense<0.000000e+00> : vector<8xf32>
    %64 = vector.multi_reduction <add>, %63, %cst_23 [1] : vector<8x512xf32> to vector<8xf32>
    %65 = vector.shape_cast %64 : vector<8xf32> to vector<8x1xf32>
    %c0_24 = arith.constant 0 : index
    %c3_25 = arith.constant 3 : index
    %66 = vector.load %arg3[%c0_24, %c3_25] : memref<1x4xf32, #tpu.memory_space<vmem>>, vector<1x1xf32>
    %67 = vector.broadcast %66 : vector<1x1xf32> to vector<8x1xf32>
    %68 = arith.addf %65, %67 : vector<8x1xf32>
    %69 = math.tanh %68 : vector<8x1xf32>
    %cst_26 = arith.constant 0.785398185 : f32
    %70 = vector.broadcast %cst_26 : f32 to vector<8x1xf32>
    %71 = arith.mulf %69, %70 : vector<8x1xf32>
    %72 = math.cos %71 : vector<8x1xf32>
    %73 = math.sin %71 : vector<8x1xf32>
    %c3_27 = arith.constant 3 : index
    %c0_28 = arith.constant 0 : index
    %74 = vector.load %arg4[%c3_27, %c0_28] : memref<4x16xf32, #tpu.memory_space<vmem>>, vector<1x16xf32>
    %75 = vector.broadcast %73 : vector<8x1xf32> to vector<8x16xf32>
    %76 = vector.broadcast %74 : vector<1x16xf32> to vector<8x16xf32>
    %77 = arith.mulf %75, %76 : vector<8x16xf32>
    %78 = vector.broadcast %72 : vector<8x1xf32> to vector<8x16xf32>
    %79 = arith.addf %78, %77 : vector<8x16xf32>
    %80 = arith.mulf %60, %79 : vector<8x16xf32>
    %c0_29 = arith.constant 0 : index
    %c0_30 = arith.constant 0 : index
    %81 = vector.load %arg5[%c0_29, %c0_30] : memref<16x16xf32, #tpu.memory_space<vmem>>, vector<16x16xf32>
    %cst_31 = arith.constant dense<0.000000e+00> : vector<8x16xf32>
    %82 = tpu.matmul %80, %81, %cst_31 {dimension_numbers = #tpu.dot_dimension_numbers<[1], [0], [0], [1], [0, 0, 1, 1], [], []>} : vector<8x16xf32>, vector<16x16xf32>, vector<8x16xf32> -> vector<8x16xf32>
    %83 = arith.mulf %82, %82 : vector<8x16xf32>
    %c0_32 = arith.constant 0 : index
    %c0_33 = arith.constant 0 : index
    %84 = vector.load %arg6[%c0_32, %c0_33] : memref<16x2xf32, #tpu.memory_space<vmem>>, vector<16x2xf32>
    %cst_34 = arith.constant dense<0.000000e+00> : vector<8x2xf32>
    %85 = tpu.matmul %83, %84, %cst_34 {dimension_numbers = #tpu.dot_dimension_numbers<[1], [0], [0], [1], [0, 0, 1, 1], [], []>} : vector<8x16xf32>, vector<16x2xf32>, vector<8x2xf32> -> vector<8x2xf32>
    %c0_35 = arith.constant 0 : index
    %c0_36 = arith.constant 0 : index
    %86 = vector.load %arg7[%c0_35, %c0_36] : memref<1x2xf32, #tpu.memory_space<vmem>>, vector<1x2xf32>
    %87 = vector.broadcast %86 : vector<1x2xf32> to vector<8x2xf32>
    %88 = arith.addf %85, %87 : vector<8x2xf32>
    %c0_37 = arith.constant 0 : index
    %c0_38 = arith.constant 0 : index
    %89 = vector.load %arg8[%c0_37, %c0_38] : memref<8x2xf32, #tpu.memory_space<vmem>>, vector<8x2xf32>
    tpu.vector_store %arg8[%c0_37, %c0_38], %88 {strides = array<i32>} : memref<8x2xf32, #tpu.memory_space<vmem>>, vector<8x2xf32>,
    return
  }
  func.func @transform_0(%arg0: i32) -> (i32, i32) {
    %c0_i32 = arith.constant 0 : i32
    %c0_i32_0 = arith.constant 0 : i32
    return %arg0, %c0_i32 : i32, i32
  }
  func.func @transform_1(%arg0: i32) -> (i32, i32) {
    %c0_i32 = arith.constant 0 : i32
    %c0_i32_0 = arith.constant 0 : i32
    %c0_i32_1 = arith.constant 0 : i32
    return %c0_i32, %c0_i32_0 : i32, i32
  }
  func.func @transform_2(%arg0: i32) -> (i32, i32) {
    %c0_i32 = arith.constant 0 : i32
    %c0_i32_0 = arith.constant 0 : i32
    %c0_i32_1 = arith.constant 0 : i32
    return %c0_i32, %c0_i32_0 : i32, i32
  }
  func.func @transform_3(%arg0: i32) -> (i32, i32) {
    %c0_i32 = arith.constant 0 : i32
    %c0_i32_0 = arith.constant 0 : i32
    %c0_i32_1 = arith.constant 0 : i32
    return %c0_i32, %c0_i32_0 : i32, i32
  }
  func.func @transform_4(%arg0: i32) -> (i32, i32) {
    %c0_i32 = arith.constant 0 : i32
    %c0_i32_0 = arith.constant 0 : i32
    %c0_i32_1 = arith.constant 0 : i32
    return %c0_i32, %c0_i32_0 : i32, i32
  }
  func.func @transform_5(%arg0: i32) -> (i32, i32) {
    %c0_i32 = arith.constant 0 : i32
    %c0_i32_0 = arith.constant 0 : i32
    %c0_i32_1 = arith.constant 0 : i32
    return %c0_i32, %c0_i32_0 : i32, i32
  }
  func.func @transform_6(%arg0: i32) -> (i32, i32) {
    %c0_i32 = arith.constant 0 : i32
    %c0_i32_0 = arith.constant 0 : i32
    %c0_i32_1 = arith.constant 0 : i32
    return %c0_i32, %c0_i32_0 : i32, i32
  }
  func.func @transform_7(%arg0: i32) -> (i32, i32) {
    %c0_i32 = arith.constant 0 : i32
    %c0_i32_0 = arith.constant 0 : i32
    return %arg0, %c0_i32 : i32, i32
  }
}

</mosaic_0001>

<bundles_post_ra>
// kernel: tpu_custom_call.1
= control target key start
LH: loop header
LB: loop body
LE: loop exit
PB: predicated region body
PF: predicated region fallthrough
CT: control target
= control target key end

     0   :  { %12 = vsyncpa [#allocation3], 0  ;;  %s1884_s0 = inlined_call_operand.vmem [shape: bf16[8,512], index: 0, kind: input, shape index: {}]   ;;  %s1885_s1 = inlined_call_operand.hbm [shape: f32[4,512], index: 1, kind: input, shape index: {}]   ;;  %s1886_s2 = inlined_call_operand.vmem [shape: f32[1,4], index: 2, kind: input, shape index: {}]   ;;  %s1887_s3 = inlined_call_operand.hbm [shape: f32[4,16], index: 3, kind: input, shape index: {}]   ;;  %s1888_s4 = inlined_call_operand.vmem [shape: f32[16,16], index: 4, kind: input, shape index: {}]   ;;  %s1889_s5 = inlined_call_operand.vmem [shape: f32[16,2], index: 5, kind: input, shape index: {}]   ;;  %s1890_s6 = inlined_call_operand.vmem [shape: f32[1,2], index: 6, kind: input, shape index: {}]   ;;  %s1891_s7 = inlined_call_operand.vmem [shape: f32[8,2], index: 7, kind: output, shape index: {}]  }
   0x1   :  { %13 = vsyncpa [#allocation5], 0  ;;  %s1444_s24 = smov [#allocation2]   ;;  %s1445_s26 = smov [#allocation4]  }
   0x2   :  { %s22_s25 = sshll.u32 %s1444_s24, 4  ;;  %s34_s27 = sshll.u32 %s1445_s26, 4  ;;  %s23_s25 = int_to_ptr.vmem [resolvable:$true] %s22_s25  ;;  %s35_s27 = int_to_ptr.vmem [resolvable:$true] %s34_s27 }
   0x3   :  { %s1396_s30 = scalar_lea.hbm %s1885_s1, 256 }
   0x4   :  { %p1397_p0 = scmp.ne.s32.totalorder %s1885_s1, %s1396_s30  ;;  %p1400_p1 = scmp.lt.u32.totalorder %s1396_s30, %s1885_s1 }
   0x6   :  { %p1402_p2 = pnand %p1400_p1, %p1397_p0 }
   0x8   :  { %1405 = shalt.err (!%p1402_p2)
}
   0x9   :  { %s1406_s12 = scalar_lea.vmem %s23_s25, 256  ;;  %p1411_p4 = scmp.lt.s32.totalorder %s23_s25, %s23_s25 }
   0xa   :  { %p1407_p3 = scmp.ne.s32.totalorder %s23_s25, %s1406_s12  ;;  %p1412_p5 = scmp.lt.s32.totalorder %s1406_s12, %s1406_s12 }
   0xc   :  { %p1413_p6 = por %p1412_p5, %p1411_p4 }
   0xe   :  { %p1414_p7 = pnand %p1413_p6, %p1407_p3 }
  0x10   :  { %1417 = shalt.err (!%p1414_p7)
}
  0x11   :  { %25 = dma.hbm_to_vmem [thread:$0]  %s1885_s1, 256, %s23_s25, [#allocation3]  }
  0x12   :  { %s1418_s17 = scalar_lea.hbm %s1887_s3, 64 }
  0x13   :  { %p1419_p8 = scmp.ne.s32.totalorder %s1887_s3, %s1418_s17  ;;  %p1422_p9 = scmp.lt.u32.totalorder %s1418_s17, %s1887_s3 }
  0x15   :  { %p1424_p10 = pnand %p1422_p9, %p1419_p8 }
  0x17   :  { %1427 = shalt.err (!%p1424_p10)
}
  0x18   :  { %s1428_s22 = scalar_lea.vmem %s35_s27, 64  ;;  %p1433_p12 = scmp.lt.s32.totalorder %s35_s27, %s35_s27 }
  0x19   :  { %p1429_p11 = scmp.ne.s32.totalorder %s35_s27, %s1428_s22  ;;  %p1434_p13 = scmp.lt.s32.totalorder %s1428_s22, %s1428_s22 }
  0x1b   :  { %p1435_p0 = por %p1434_p13, %p1433_p12 }
  0x1d   :  { %p1436_p1 = pnand %p1435_p0, %p1429_p11 }
  0x1f   :  { %1439 = shalt.err (!%p1436_p1)
}
  0x20   :  { %37 = dma.hbm_to_vmem [thread:$0]  %s1887_s3, 64, %s35_s27, [#allocation5]  }
  0x21   :  { %1440 = dma.done.wait [#allocation3], 256  }
  0x22   :  { %1441 = vsyncadd [#allocation3], 4294967040 }
  0x23   :  { %1442 = dma.done.wait [#allocation5], 64  }
  0x24   :  { %1443 = vsyncadd [#allocation5], 4294967232  ;;  %v58_v0 = vlaneseq  ;;  %v50_v6 = vld [vmem:[%s1884_s0] sm:$0xff]  ;;  %v51_v7 = vld [vmem:[%s1884_s0 + $0x8] sm:$0xff]  ;;  %v1446_v60 = vmov 0   ;;  %v1447_v61 = vmov 1  }
  0x25   :  { %v582_v8 = vld [vmem:[#allocation2 + $0x2] ss:$4 sm:$0xf]  ;;  %v52_v9 = vunpack.c.l.bf16 %v50_v6  ;;  %v53_v10 = vunpack.c.h.bf16 %v50_v6  ;;  %v54_v11 = vunpack.c.l.bf16 %v51_v7  ;;  %v55_v12 = vunpack.c.h.bf16 %v51_v7  ;;  %v56_v13 = vld [vmem:[#allocation2] ss:$4 sm:$0xf]  ;;  %1365 = vset.pattern.permute.xlu0 %v1446_v60  ;;  %1366 = vset.pattern.permute.xlu1 %v1447_v61 }
  0x26   :  { %v59_v1 = vshrl.u32 %v58_v0, 7  ;;  %v842_v22 = vld [vmem:[#allocation2 + $0x3] ss:$4 sm:$0xf]  ;;  %v1268_v62 = vld [vmem:[%s1886_s2] ss:$0 sm:$0xff] }
  0x27   :  { %v322_v27 = vld [vmem:[#allocation2 + $0x1] ss:$4 sm:$0xf] }
  0x28   :  { %v60_v2 = vsub.s32 0, %v59_v1  ;;  %v64_v3 = vsub.s32 1, %v59_v1  ;;  %v68_v4 = vsub.s32 2, %v59_v1  ;;  %v72_v5 = vsub.s32 3, %v59_v1 }
  0x2a   :  { %v587_v14 = vrot.slane %v582_v8, %v60_v2  ;;  %v591_v15 = vrot.slane %v582_v8, %v64_v3  ;;  %v595_v16 = vrot.slane %v582_v8, %v68_v4  ;;  %v599_v17 = vrot.slane %v582_v8, %v72_v5 }
  0x2b   :  { %v61_v18 = vrot.slane %v56_v13, %v60_v2  ;;  %v65_v19 = vrot.slane %v56_v13, %v64_v3  ;;  %v69_v20 = vrot.slane %v56_v13, %v68_v4  ;;  %v73_v21 = vrot.slane %v56_v13, %v72_v5 }
  0x2c   :  { %v604_v23 = vmul.f32 %v587_v14, %v52_v9  ;;  %v605_v24 = vmul.f32 %v591_v15, %v53_v10  ;;  %v606_v25 = vmul.f32 %v595_v16, %v54_v11  ;;  %v607_v26 = vmul.f32 %v599_v17, %v55_v12 }
  0x2d   :  { %v78_v28 = vmul.f32 %v61_v18, %v52_v9  ;;  %v79_v29 = vmul.f32 %v65_v19, %v53_v10  ;;  %v80_v30 = vmul.f32 %v69_v20, %v54_v11  ;;  %v81_v31 = vmul.f32 %v73_v21, %v55_v12 }
  0x2e   :  { %v608_v32 = vadd.f32 %v605_v24, %v604_v23  ;;  %v847_v33 = vrot.slane %v842_v22, %v60_v2  ;;  %v851_v34 = vrot.slane %v842_v22, %v64_v3  ;;  %v855_v35 = vrot.slane %v842_v22, %v68_v4 }
  0x2f   :  { %v82_v36 = vadd.f32 %v79_v29, %v78_v28  ;;  %v859_v37 = vrot.slane %v842_v22, %v72_v5  ;;  %v327_v38 = vrot.slane %v322_v27, %v60_v2  ;;  %v331_v39 = vrot.slane %v322_v27, %v64_v3 }
  0x30   :  { %v609_v40 = vadd.f32 %v608_v32, %v606_v25  ;;  %v864_v41 = vmul.f32 %v847_v33, %v52_v9  ;;  %v865_v42 = vmul.f32 %v851_v34, %v53_v10  ;;  %v866_v43 = vmul.f32 %v855_v35, %v54_v11 }
  0x31   :  { %v83_v44 = vadd.f32 %v82_v36, %v80_v30  ;;  %v867_v45 = vmul.f32 %v859_v37, %v55_v12  ;;  %v335_v46 = vrot.slane %v322_v27, %v68_v4  ;;  %v339_v47 = vrot.slane %v322_v27, %v72_v5 }
  0x32   :  { %v610_v48 = vadd.f32 %v609_v40, %v607_v26  ;;  %v868_v49 = vadd.f32 %v865_v42, %v864_v41  ;;  %v344_v50 = vmul.f32 %v327_v38, %v52_v9  ;;  %v345_v51 = vmul.f32 %v331_v39, %v53_v10 }
  0x33   :  { %v84_v52 = vadd.f32 %v83_v44, %v81_v31  ;;  %v346_v53 = vmul.f32 %v335_v46, %v54_v11  ;;  %v347_v55 = vmul.f32 %v339_v47, %v55_v12  ;;  %v1448_v39 = vmov 683565275  }
  0x34   :  { %611 = vadd.xlane.f32.xlu1 %v610_v48  ;;  %v869_v54 = vadd.f32 %v868_v49, %v866_v43  ;;  %v348_v56 = vadd.f32 %v345_v51, %v344_v50  ;;  %v1449_v42 = vmov 2475754826   ;;  %v1451_v49 = vmov 2102212464  }
  0x35   :  { %85 = vadd.xlane.f32.xlu0 %v84_v52 }
  0x36   :  { %v870_v57 = vadd.f32 %v869_v54, %v867_v45  ;;  %v349_v58 = vadd.f32 %v348_v56, %v346_v53  ;;  %v1450_v45 = vmov 2131351028  }
  0x38   :  { %871 = vadd.xlane.f32.xlu1 %v870_v57  ;;  %v350_v59 = vadd.f32 %v349_v58, %v347_v55  ;;  %v1452_v57 = vmov 920167782  }
  0x3a   :  { %351 = vadd.xlane.f32.xlu0 %v350_v59 }
  0xc1   :  { %v612_v63 = vpop.xlane.xlu1 %611 }
  0xc2   :  { %v613_v0 = vadd.f32 %v1268_v62, %v612_v63  ;;  %v86_v1 = vpop.xlane.xlu0 %85 }
  0xc3   :  { %v94_v2 = vadd.f32 %v1268_v62, %v86_v1 }
  0xc4   :  { %1372 = vtanh.f32 %v613_v0 }
  0xc5   :  { %1374 = vtanh.f32 %v94_v2  ;;  %v872_v3 = vpop.xlane.xlu1 %871 }
  0xc6   :  { %v873_v6 = vadd.f32 %v1268_v62, %v872_v3 }
  0xc7   :  { %v352_v4 = vpop.xlane.xlu0 %351 }
  0xc8   :  { %v353_v5 = vadd.f32 %v1268_v62, %v352_v4  ;;  %v1453_v62 = vmov 1326507024  }
  0xca   :  { %1376 = vtanh.f32 %v353_v5 }
  0xcb   :  { %1378 = vtanh.f32 %v873_v6 }
  0xce   :  { %v1373_v7 = vpop.eup %1372 }
  0xcf   :  { %v1375_v8 = vpop.eup %1374  ;;  %v1534_v9 = vmul.f32 0.7853982, %v1373_v7 }
  0xd0   :  { %v1536_v10 = vmul.f32 0.7853982, %v1375_v8 }
  0xd1   :  { %v619_v11 = vand.u32 2139095040, %v1534_v9 }
  0xd2   :  { %v100_v12 = vand.u32 2139095040, %v1536_v10  ;;  %v97_v14 = vand.u32 2147483647, %v1536_v10 }
  0xd3   :  { %v620_v13 = vshrl.u32 %v619_v11, 23 }
  0xd4   :  { %v1377_v15 = vpop.eup %1376  ;;  %v101_v16 = vshrl.u32 %v100_v12, 23  ;;  %v104_v23 = vand.u32 8388607, %v97_v14 }
  0xd5   :  { %v1287_v17 = vadd.s32 4294967169, %v620_v13  ;;  %v1541_v18 = vmul.f32 0.7853982, %v1377_v15  ;;  %v1379_v20 = vpop.eup %1378 }
  0xd6   :  { %v1269_v19 = vadd.s32 4294967169, %v101_v16  ;;  %v1547_v27 = vmul.f32 0.7853982, %v1379_v20  ;;  %v105_v29 = vor.u32 8388608, %v104_v23 }
  0xd7   :  { %v626_v21 = vadd.s32 1, %v1287_v17  ;;  %v359_v22 = vand.u32 2139095040, %v1541_v18  ;;  %v356_v26 = vand.u32 2147483647, %v1541_v18 }
  0xd8   :  { %v107_v24 = vadd.s32 1, %v1269_v19  ;;  %v879_v35 = vand.u32 2139095040, %v1547_v27  ;;  %v1560_v41 = vshll.u32 %v105_v29, 8 }
  0xd9   :  { %vm627_vm0 = vcmp.gt.s32.totalorder %v626_v21, 0  ;;  %v360_v25 = vshrl.u32 %v359_v22, 23  ;;  %v1553_v33 = vand.u32 8388607, %v356_v26 }
  0xda   :  { %vm108_vm1 = vcmp.gt.s32.totalorder %v107_v24, 0  ;;  %v1549_v30 = vsel %vm627_vm0, %v626_v21, 0 }
  0xdb   :  { %v109_v28 = vsel %vm108_vm1, %v107_v24, 0  ;;  %v1278_v32 = vadd.s32 4294967169, %v360_v25  ;;  %v1557_v37 = vand.u32 31, %v1549_v30  ;;  %v364_v51 = vor.u32 8388608, %v1553_v33 }
  0xdc   :  { %v111_v31 = vand.u32 31, %v109_v28  ;;  %v110_v38 = vshrl.u32 %v109_v28, 5 }
  0xdd   :  { %v366_v36 = vadd.s32 1, %v1278_v32 }
  0xde   :  { %v112_v34 = vsub.s32 32, %v111_v31  ;;  %v114_v40 = vshll.u32 %v1448_v39, %v111_v31  ;;  %v117_v44 = vshll.u32 %v1449_v42, %v111_v31  ;;  %v120_v48 = vshll.u32 %v1450_v45, %v111_v31 }
  0xdf   :  { %vm367_vm2 = vcmp.gt.s32.totalorder %v366_v36, 0  ;;  %v123_v55 = vshll.u32 %v1451_v49, %v111_v31  ;;  %v126_v59 = vshll.u32 %v1452_v57, %v111_v31  ;;  %vm129_vm3 = vcmp.lt.s32.totalorder %v110_v38, 1 }
  0xe0   :  { %v115_v43 = vshrl.u32 %v1449_v42, %v112_v34  ;;  %v118_v46 = vshrl.u32 %v1450_v45, %v112_v34  ;;  %v368_v47 = vsel %vm367_vm2, %v366_v36, 0  ;;  %v121_v50 = vshrl.u32 %v1451_v49, %v112_v34 }
  0xe1   :  { %v370_v52 = vand.u32 31, %v368_v47  ;;  %v124_v58 = vshrl.u32 %v1452_v57, %v112_v34  ;;  %v127_v63 = vshrl.u32 %v1453_v62, %v112_v34  ;;  %v1572_v0 = vshrl.u32 %v368_v47, 5 }
  0xe2   :  { %v116_v53 = vor.u32 %v115_v43, %v114_v40  ;;  %v119_v54 = vor.u32 %v118_v46, %v117_v44  ;;  %v122_v56 = vor.u32 %v121_v50, %v120_v48  ;;  %v113_v2 = vshrl.u32 %v1448_v39, %v112_v34 }
  0xe3   :  { %v371_v1 = vsub.s32 32, %v370_v52  ;;  %v125_v3 = vor.u32 %v124_v58, %v123_v55  ;;  %v128_v4 = vor.u32 %v127_v63, %v126_v59  ;;  %vm131_vm4 = vcmp.lt.s32.totalorder %v110_v38, 3 }
  0xe4   :  { %vm132_vm5 = vcmp.lt.s32.totalorder %v110_v38, 4  ;;  %v133_v5 = vsel %vm129_vm3, %v113_v2, %v116_v53  ;;  %v137_v7 = vsel %vm129_vm3, %v116_v53, %v119_v54  ;;  %v141_v8 = vsel %vm129_vm3, %v119_v54, %v122_v56 }
  0xe5   :  { %v134_v6 = vsel %vm132_vm5, %v122_v56, 2102212464  ;;  %vm130_vm6 = vcmp.lt.s32.totalorder %v110_v38, 2  ;;  %v138_v12 = vsel %vm132_vm5, %v125_v3, 920167782  ;;  %v372_v17 = vshrl.u32 %v1448_v39, %v371_v1 }
  0xe6   :  { %v135_v11 = vsel %vm131_vm4, %v119_v54, %v134_v6  ;;  %v142_v13 = vsel %vm132_vm5, %v128_v4, 1326507024  ;;  %v139_v15 = vsel %vm131_vm4, %v122_v56, %v138_v12  ;;  %v374_v19 = vshrl.u32 %v1449_v42, %v371_v1 }
  0xe7   :  { %v143_v16 = vsel %vm131_vm4, %v125_v3, %v142_v13  ;;  %v136_v20 = vsel %vm130_vm6, %v133_v5, %v135_v11  ;;  %v140_v21 = vsel %vm130_vm6, %v137_v7, %v139_v15  ;;  %v373_v23 = vshll.u32 %v1448_v39, %v370_v52 }
  0xe8   :  { %v144_v22 = vsel %vm130_vm6, %v141_v8, %v143_v16  ;;  %v1583_v28 = vmul.u32.u64.low %v1560_v41, %v140_v21  ;;  %v1584_v29 = vmul.u32.u64.high %v1560_v41, %v140_v21, %v1583_v28  ;;  %v376_v31 = vshll.u32 %v1449_v42, %v370_v52 }
  0xe9   :  { %v1579_v24 = vmul.u32.u64.low %v1560_v41, %v144_v22  ;;  %v1580_v25 = vmul.u32.u64.high %v1560_v41, %v144_v22, %v1579_v24  ;;  %v377_v32 = vshrl.u32 %v1450_v45, %v371_v1  ;;  %v379_v34 = vshll.u32 %v1450_v45, %v370_v52 }
  0xea   :  { %v380_v36 = vshrl.u32 %v1451_v49, %v371_v1  ;;  %v375_v38 = vor.u32 %v374_v19, %v373_v23  ;;  %v382_v40 = vshll.u32 %v1451_v49, %v370_v52  ;;  %v383_v43 = vshrl.u32 %v1452_v57, %v371_v1 }
  0xeb   :  { %v386_v44 = vshrl.u32 %v1453_v62, %v371_v1  ;;  %v152_v46 = vmul.u32 %v1560_v41, %v136_v20  ;;  %v378_v47 = vor.u32 %v377_v32, %v376_v31  ;;  %v385_v50 = vshll.u32 %v1452_v57, %v370_v52 }
  0xec   :  { %v381_v48 = vor.u32 %v380_v36, %v379_v34  ;;  %vm154_vm7 = vc.u32 %v1580_v25, %v1583_v28  ;;  %v155_v53 = vadd.s32 1, %v1584_v29  ;;  %v384_v54 = vor.u32 %v383_v43, %v382_v40 }
  0xed   :  { %vm388_vm8 = vcmp.lt.s32.totalorder %v1572_v0, 1  ;;  %v387_v55 = vor.u32 %v386_v44, %v385_v50  ;;  %vm389_vm9 = vcmp.lt.s32.totalorder %v1572_v0, 2  ;;  %vm390_vm10 = vcmp.lt.s32.totalorder %v1572_v0, 3 }
  0xee   :  { %vm391_vm11 = vcmp.lt.s32.totalorder %v1572_v0, 4  ;;  %v156_v41 = vsel %vm154_vm7, %v155_v53, %v1584_v29  ;;  %v396_v58 = vsel %vm388_vm8, %v375_v38, %v378_v47  ;;  %v392_v63 = vsel %vm388_vm8, %v372_v17, %v375_v38 }
  0xef   :  { %v393_v56 = vsel %vm391_vm11, %v381_v48, 2102212464  ;;  %v397_v52 = vsel %vm391_vm11, %v384_v54, 920167782  ;;  %v157_v59 = vadd.s32 %v156_v41, %v152_v46  ;;  %v400_v2 = vsel %vm388_vm8, %v378_v47, %v381_v48 }
  0xf0   :  { %v398_v1 = vsel %vm390_vm10, %v381_v48, %v397_v52  ;;  %v394_v3 = vsel %vm390_vm10, %v378_v47, %v393_v56  ;;  %v401_v5 = vsel %vm391_vm11, %v387_v55, 1326507024  ;;  %v404_v6 = vshll.u32 %v364_v51, 8 }
  0xf1   :  { %v399_v4 = vsel %vm389_vm9, %v396_v58, %v398_v1  ;;  %v880_v7 = vshrl.u32 %v879_v35, 23  ;;  %v158_v8 = vadd.s32 536870912, %v157_v59  ;;  %v402_v11 = vsel %vm390_vm10, %v384_v54, %v401_v5 }
  0xf2   :  { %v631_v12 = vsub.s32 32, %v1557_v37  ;;  %v403_v13 = vsel %vm389_vm9, %v400_v2, %v402_v11  ;;  %v1619_v15 = vmul.u32.u64.low %v404_v6, %v399_v4  ;;  %v1620_v16 = vmul.u32.u64.high %v404_v6, %v399_v4, %v1619_v15 }
  0xf3   :  { %v1623_v17 = vshrl.u32 %v158_v8, 30  ;;  %v395_v33 = vsel %vm389_vm9, %v392_v63, %v394_v3  ;;  %v1627_v51 = vmul.u32.u64.low %v404_v6, %v403_v13  ;;  %v1628_v35 = vmul.u32.u64.high %v404_v6, %v403_v13, %v1627_v51 }
  0xf4   :  { %v616_v19 = vand.u32 2147483647, %v1534_v9  ;;  %v1632_v20 = vshrl.u32 %v1549_v30, 5  ;;  %v1296_v21 = vadd.s32 4294967169, %v880_v7  ;;  %v636_v23 = vshll.u32 %v1449_v42, %v1557_v37 }
  0xf5   :  { %v160_v22 = vshll.u32 %v1623_v17, 30  ;;  %v411_v24 = vmul.u32 %v404_v6, %v395_v33  ;;  %v414_v29 = vadd.s32 1, %v1620_v16  ;;  %v637_v0 = vshrl.u32 %v1450_v45, %v631_v12 }
  0xf6   :  { %v639_v31 = vshll.u32 %v1450_v45, %v1557_v37  ;;  %vm413_vm12 = vc.u32 %v1628_v35, %v1619_v15  ;;  %v640_v30 = vshrl.u32 %v1451_v49, %v631_v12  ;;  %v642_v34 = vshll.u32 %v1451_v49, %v1557_v37 }
  0xf7   :  { %v161_v32 = vsub.s32 %v157_v59, %v160_v22  ;;  %v415_v36 = vsel %vm413_vm12, %v414_v29, %v1620_v16  ;;  %v643_v38 = vshrl.u32 %v1452_v57, %v631_v12  ;;  %v645_v40 = vshll.u32 %v1452_v57, %v1557_v37 }
  0xf8   :  { %v646_v43 = vshrl.u32 %v1453_v62, %v631_v12  ;;  %v416_v46 = vadd.s32 %v415_v36, %v411_v24  ;;  %v623_v47 = vand.u32 8388607, %v616_v19  ;;  %v886_v48 = vadd.s32 1, %v1296_v21 }
  0xf9   :  { %v163_v44 = vsub.s32 0, %v161_v32  ;;  %v633_v50 = vshll.u32 %v1448_v39, %v1557_v37  ;;  %v634_v53 = vshrl.u32 %v1449_v42, %v631_v12  ;;  %v638_v41 = vor.u32 %v637_v0, %v636_v23 }
  0xfa   :  { %v417_v55 = vadd.s32 536870912, %v416_v46  ;;  %v641_v56 = vor.u32 %v640_v30, %v639_v31  ;;  %v644_v58 = vor.u32 %v643_v38, %v642_v34  ;;  %v647_v52 = vor.u32 %v646_v43, %v645_v40 }
  0xfb   :  { %v1270_v54 = vmin.u32 %v163_v44, %v161_v32  ;;  %vm648_vm13 = vcmp.lt.s32.totalorder %v1632_v20, 1  ;;  %v624_v63 = vor.u32 8388608, %v623_v47  ;;  %vm651_vm14 = vcmp.lt.s32.totalorder %v1632_v20, 4 }
  0xfc   :  { %vm887_vm15 = vcmp.gt.s32.totalorder %v886_v48, 0  ;;  %v1658_v1 = vshrl.u32 %v417_v55, 30  ;;  %vm650_vm0 = vcmp.lt.s32.totalorder %v1632_v20, 3  ;;  %v635_v2 = vor.u32 %v634_v53, %v633_v50 }
  0xfd   :  { %v165_v59 = vclz %v1270_v54  ;;  %vm649_vm1 = vcmp.lt.s32.totalorder %v1632_v20, 2  ;;  %v660_v3 = vsel %vm648_vm13, %v638_v41, %v641_v56  ;;  %v153_v4 = vadd.s32 %v1583_v28, %v1580_v25 }
  0xfe   :  { %v419_v5 = vshll.u32 %v1658_v1, 30  ;;  %v657_v6 = vsel %vm651_vm14, %v644_v58, 920167782  ;;  %v661_v7 = vsel %vm651_vm14, %v647_v52, 1326507024  ;;  %v632_v8 = vshrl.u32 %v1448_v39, %v631_v12 }
  0xff   :  { %v1271_v37 = vadd.s32 4294967294, %v165_v59  ;;  %v662_v11 = vsel %vm650_vm0, %v644_v58, %v661_v7  ;;  %v664_v13 = vshll.u32 %v624_v63, 8  ;;  %v653_v25 = vsel %vm651_vm14, %v641_v56, 2102212464 }
 0x100   :  { %v420_v33 = vsub.s32 %v416_v46, %v419_v5  ;;  %v663_v28 = vsel %vm649_vm1, %v660_v3, %v662_v11  ;;  %v656_v22 = vsel %vm648_vm13, %v635_v2, %v638_v41  ;;  %v658_v12 = vsel %vm650_vm0, %v641_v56, %v657_v6 }
 0x101   :  { %vm1272_vm2 = vcmp.lt.s32.totalorder %v1271_v37, 0  ;;  %v888_v23 = vsel %vm887_vm15, %v886_v48, 0  ;;  %v183_v29 = vsub.s32 4, %v1623_v17  ;;  %v652_v40 = vsel %vm648_vm13, %v632_v8, %v635_v2 }
 0x102   :  { %v168_v16 = vsel %vm1272_vm2, 0, %v1271_v37  ;;  %v422_v0 = vsub.s32 0, %v420_v33  ;;  %v1684_v34 = vmul.u32.u64.low %v664_v13, %v663_v28  ;;  %v1685_v36 = vmul.u32.u64.high %v664_v13, %v663_v28, %v1684_v34 }
 0x103   :  { %v169_v51 = vsub.s32 32, %v168_v16  ;;  %v173_v21 = vsub.s32 4294967266, %v168_v16  ;;  %v170_v24 = vshll.u32 %v161_v32, %v168_v16  ;;  %v654_v43 = vsel %vm650_vm0, %v638_v41, %v653_v25 }
 0x104   :  { %v1279_v38 = vmin.u32 %v422_v0, %v420_v33  ;;  %v659_v44 = vsel %vm649_vm1, %v656_v22, %v658_v12  ;;  %v890_v46 = vand.u32 31, %v888_v23  ;;  %vm99_vm3 = vcmp.lt.s32.totalorder %v1536_v10, 0 }
 0x105   :  { %v171_v31 = vshrl.u32 %v153_v4, %v169_v51  ;;  %v174_v30 = vadd.s32 127, %v173_v21  ;;  %v184_v48 = vsel %vm99_vm3, %v183_v29, %v1623_v17  ;;  %v655_v54 = vsel %vm649_vm1, %v652_v40, %v654_v43 }
 0x106   :  { %v424_v50 = vclz %v1279_v38  ;;  %v1699_v55 = vmul.u32.u64.low %v664_v13, %v659_v44  ;;  %v1700_v56 = vmul.u32.u64.high %v664_v13, %v659_v44, %v1699_v55  ;;  %vm1705_vm4 = vcmp.le.f32.partialorder %v97_v14, 0.7853982 }
 0x107   :  { %v172_v32 = vor.u32 %v171_v31, %v170_v24  ;;  %v175_v47 = vshll.u32 %v174_v30, 23  ;;  %v1709_v52 = vsub.s32 32, %v890_v46  ;;  %v1713_v63 = vsel %vm1705_vm4, 0, %v184_v48 }
 0x108   :  { %v1280_v58 = vadd.s32 4294967294, %v424_v50  ;;  %v671_v20 = vmul.u32 %v664_v13, %v655_v54  ;;  %vm673_vm6 = vc.u32 %v1685_v36, %v1699_v55  ;;  %v876_v37 = vand.u32 2147483647, %v1547_v27 }
 0x109   :  { %v176_v53 = vor.u32 4788187, %v175_v47  ;;  %v179_v17 = vcvt.s32.f32 %v172_v32  ;;  %v1718_v14 = vshrl.u32 %v888_v23, 5  ;;  %v674_v4 = vadd.s32 1, %v1700_v56 }
 0x10a   :  { %vm1281_vm5 = vcmp.lt.s32.totalorder %v1280_v58, 0  ;;  %v293_v5 = vadd.s32 3, %v1713_v63  ;;  %v412_v6 = vadd.s32 %v1619_v15, %v1628_v35  ;;  %v896_v16 = vshll.u32 %v1449_v42, %v890_v46 }
 0x10b   :  { %v177_v59 = vand.u32 2147483647, %v176_v53  ;;  %v427_v3 = vsel %vm1281_vm5, 0, %v1280_v58  ;;  %v675_v13 = vsel %vm673_vm6, %v674_v4, %v1700_v56  ;;  %v897_v25 = vshrl.u32 %v1450_v45, %v1709_v52 }
 0x10c   :  { %v428_v7 = vsub.s32 32, %v427_v3  ;;  %v432_v8 = vsub.s32 4294967266, %v427_v3  ;;  %vm358_vm7 = vcmp.lt.s32.totalorder %v1541_v18, 0  ;;  %v429_v28 = vshll.u32 %v420_v33, %v427_v3 }
 0x10d   :  { %v180_v2 = vmul.f32 %v179_v17, %v177_v59  ;;  %v676_v22 = vadd.s32 %v675_v13, %v671_v20  ;;  %v899_v15 = vshll.u32 %v1450_v45, %v890_v46  ;;  %v905_v35 = vshll.u32 %v1452_v57, %v890_v46 }
 0x10e   :  { %v430_v51 = vshrl.u32 %v412_v6, %v428_v7  ;;  %v433_v21 = vadd.s32 127, %v432_v8  ;;  %v906_v23 = vshrl.u32 %v1453_v62, %v1709_v52  ;;  %v900_v31 = vshrl.u32 %v1451_v49, %v1709_v52 }
 0x10f   :  { %v181_v11 = vxor.u32 2147483648, %v180_v2  ;;  %v677_v33 = vadd.s32 536870912, %v676_v22  ;;  %v902_v30 = vshll.u32 %v1451_v49, %v890_v46  ;;  %v903_v45 = vshrl.u32 %v1452_v57, %v1709_v52 }
 0x110   :  { %v431_v29 = vor.u32 %v430_v51, %v429_v28  ;;  %v434_v0 = vshll.u32 %v433_v21, 23  ;;  %v294_v34 = vand.u32 3, %v293_v5  ;;  %v442_v40 = vsub.s32 4, %v1658_v1 }
 0x111   :  { %v182_v12 = vsel %vm99_vm3, %v181_v11, %v180_v2  ;;  %v1743_v62 = vshrl.u32 %v677_v33, 30  ;;  %v883_v43 = vand.u32 8388607, %v876_v37  ;;  %v893_v44 = vshll.u32 %v1448_v39, %v890_v46 }
 0x112   :  { %v185_v24 = vsel %vm1705_vm4, %v1536_v10, %v182_v12  ;;  %v435_v38 = vor.u32 4788187, %v434_v0  ;;  %v907_v32 = vor.u32 %v906_v23, %v905_v35  ;;  %v438_v48 = vcvt.s32.f32 %v431_v29 }
 0x113   :  { %1380 = vcosq.f32 %v185_v24  ;;  %v679_v49 = vshll.u32 %v1743_v62, 30  ;;  %vm911_vm8 = vcmp.lt.s32.totalorder %v1718_v14, 4  ;;  %v894_v57 = vshrl.u32 %v1449_v42, %v1709_v52 }
 0x114   :  { %1382 = vsinq.f32 %v185_v24  ;;  %v436_v47 = vand.u32 2147483647, %v435_v38  ;;  %v898_v50 = vor.u32 %v897_v25, %v896_v16  ;;  %v901_v53 = vor.u32 %v900_v31, %v899_v15 }
 0x115   :  { %v904_v54 = vor.u32 %v903_v45, %v902_v30  ;;  %v1753_v41 = vsub.s32 %v676_v22, %v679_v49  ;;  %vm908_vm9 = vcmp.lt.s32.totalorder %v1718_v14, 1  ;;  %vm910_vm10 = vcmp.lt.s32.totalorder %v1718_v14, 3 }
 0x116   :  { %v439_v56 = vmul.f32 %v438_v48, %v436_v47  ;;  %vm1759_vm11 = vcmp.le.f32.partialorder %v356_v26, 0.7853982  ;;  %v443_v42 = vsel %vm358_vm7, %v442_v40, %v1658_v1  ;;  %v884_v58 = vor.u32 8388608, %v883_v43 }
 0x117   :  { %v921_v59 = vsel %vm911_vm8, %v907_v32, 1326507024  ;;  %vm189_vm12 = vweird.f32 %v1536_v10  ;;  %vm295_vm13 = vcmp.lt.s32.totalorder %v294_v34, 2  ;;  %vm299_vm14 = vcmp.eq.s32.totalorder %v294_v34, 2 }
 0x118   :  { %v440_v17 = vxor.u32 2147483648, %v439_v56  ;;  %v682_v20 = vsub.s32 0, %v1753_v41  ;;  %v895_v2 = vor.u32 %v894_v57, %v893_v44  ;;  %vm909_vm15 = vcmp.lt.s32.totalorder %v1718_v14, 2 }
 0x119   :  { %v920_v26 = vsel %vm908_vm9, %v898_v50, %v901_v53  ;;  %v922_v1 = vsel %vm910_vm10, %v904_v54, %v921_v59  ;;  %v445_v4 = vsel %vm1759_vm11, 0, %v443_v42  ;;  %v917_v6 = vsel %vm911_vm8, %v904_v54, 920167782 }
 0x11a   :  { %v441_v3 = vsel %vm358_vm7, %v440_v17, %v439_v56  ;;  %v1288_v5 = vmin.u32 %v682_v20, %v1753_v41  ;;  %v892_v11 = vshrl.u32 %v1448_v39, %v1709_v52  ;;  %v913_v13 = vsel %vm911_vm8, %v901_v53, 2102212464 }
 0x11b   :  { %v444_v8 = vsel %vm1759_vm11, %v1541_v18, %v441_v3  ;;  %v924_v16 = vshll.u32 %v884_v58, 8  ;;  %v923_v21 = vsel %vm909_vm15, %v920_v26, %v922_v1  ;;  %v916_v12 = vsel %vm908_vm9, %v895_v2, %v898_v50 }
 0x11c   :  { %1384 = vcosq.f32 %v444_v8  ;;  %v684_v51 = vclz %v1288_v5  ;;  %v918_v39 = vsel %vm910_vm10, %v901_v53, %v917_v6  ;;  %vm296_vm0 = vcmp.eq.s32.totalorder %v294_v34, 0 }
 0x11d   :  { %v1782_v7 = vpop.eup %1380  ;;  %1386 = vsinq.f32 %v444_v8  ;;  %v552_v15 = vadd.s32 3, %v445_v4  ;;  %v912_v24 = vsel %vm908_vm9, %v892_v11, %v895_v2  ;;  %v914_v31 = vsel %vm910_vm10, %v898_v50, %v913_v13 }
 0x11e   :  { %v1791_v25 = vpop.eup %1382  ;;  %v196_v28 = vxor.u32 2147483648, %v1782_v7  ;;  %v1289_v35 = vadd.s32 4294967294, %v684_v51  ;;  %v1806_v29 = vmul.u32.u64.low %v924_v16, %v923_v21  ;;  %v1807_v0 = vmul.u32.u64.high %v924_v16, %v923_v21, %v1806_v29 }
 0x11f   :  { %v193_v22 = vxor.u32 2147483648, %v1791_v25  ;;  %v919_v30 = vsel %vm909_vm15, %v916_v12, %v918_v39  ;;  %v672_v40 = vadd.s32 %v1699_v55, %v1685_v36  ;;  %v190_v34 = vand.u32 3, %v1713_v63 }
 0x120   :  { %v301_v52 = vsel %vm299_vm14, %v196_v28, %v1791_v25  ;;  %vm1290_vm1 = vcmp.lt.s32.totalorder %v1289_v35, 0  ;;  %v915_v32 = vsel %vm909_vm15, %v912_v24, %v914_v31  ;;  %v553_v49 = vand.u32 3, %v552_v15 }
 0x121   :  { %v298_v23 = vsel %vm296_vm0, %v1782_v7, %v193_v22  ;;  %v687_v38 = vsel %vm1290_vm1, 0, %v1289_v35  ;;  %v1821_v47 = vmul.u32.u64.low %v924_v16, %v919_v30  ;;  %v1822_v48 = vmul.u32.u64.high %v924_v16, %v919_v30, %v1821_v47 }
 0x122   :  { %v302_v33 = vsel %vm295_vm13, %v298_v23, %v301_v52  ;;  %v688_v43 = vsub.s32 32, %v687_v38  ;;  %v692_v44 = vsub.s32 4294967266, %v687_v38  ;;  %v689_v57 = vshll.u32 %v1753_v41, %v687_v38 }
 0x123   :  { %v303_v45 = vsel %vm189_vm12, nan, %v302_v33  ;;  %vm448_vm2 = vweird.f32 %v1541_v18  ;;  %v931_v56 = vmul.u32 %v924_v16, %v915_v32  ;;  %vm933_vm3 = vc.u32 %v1807_v0, %v1821_v47 }
 0x124   :  { %307 = vperm.xlu0 %1365, %v303_v45   ;;  %v690_v50 = vshrl.u32 %v672_v40, %v688_v43  ;;  %v693_v53 = vadd.s32 127, %v692_v44  ;;  %v1454_v63 = vmov 3   ;;  %vm192_vm4 = vcmp.eq.s32.totalorder %v190_v34, 0 }
 0x125   :  { %vm195_vm5 = vcmp.eq.s32.totalorder %v190_v34, 2  ;;  %v934_v41 = vadd.s32 1, %v1822_v48  ;;  %vm558_vm6 = vcmp.eq.s32.totalorder %v553_v49, 2  ;;  %v449_v58 = vand.u32 3, %v445_v4 }
 0x126   :  { %v1385_v54 = vpop.eup %1384  ;;  %v691_v36 = vor.u32 %v690_v50, %v689_v57  ;;  %v694_v55 = vshll.u32 %v693_v53, 23  ;;  %vm554_vm7 = vcmp.lt.s32.totalorder %v553_v49, 2  ;;  %vm555_vm8 = vcmp.eq.s32.totalorder %v553_v49, 0 }
 0x127   :  { %v1387_v14 = vpop.eup %1386  ;;  %v455_v46 = vxor.u32 2147483648, %v1385_v54  ;;  %v935_v20 = vsel %vm933_vm3, %v934_v41, %v1822_v48  ;;  %v194_v6 = vsel %vm192_vm4, %v1782_v7, %v193_v22  ;;  %v197_v8 = vsel %vm195_vm5, %v196_v28, %v1791_v25 }
 0x128   :  { %1371 = vset.pattern.permute.xlu0 %v1454_v63  ;;  %v452_v42 = vxor.u32 2147483648, %v1387_v14  ;;  %v695_v59 = vor.u32 4788187, %v694_v55  ;;  %v698_v1 = vcvt.s32.f32 %v691_v36  ;;  %v936_v3 = vadd.s32 %v935_v20, %v931_v56 }
 0x129   :  { %v560_v17 = vsel %vm558_vm6, %v455_v46, %v1387_v14  ;;  %v702_v11 = vsub.s32 4, %v1743_v62  ;;  %vm191_vm9 = vcmp.lt.s32.totalorder %v190_v34, 2  ;;  %vm618_vm10 = vcmp.lt.s32.totalorder %v1534_v9, 0 }
 0x12a   :  { %v557_v2 = vsel %vm555_vm8, %v1385_v54, %v452_v42  ;;  %v696_v26 = vand.u32 2147483647, %v695_v59  ;;  %v937_v16 = vadd.s32 536870912, %v936_v3  ;;  %v198_v51 = vsel %vm191_vm9, %v194_v6, %v197_v8 }
 0x12b   :  { %v561_v5 = vsel %vm554_vm7, %v557_v2, %v560_v17  ;;  %vm451_vm11 = vcmp.eq.s32.totalorder %v449_v58, 0  ;;  %vm454_vm13 = vcmp.eq.s32.totalorder %v449_v58, 2  ;;  %vm617_vm14 = vcmp.le.f32.partialorder %v616_v19, 0.7853982 }
 0x12c   :  { %v562_v4 = vsel %vm448_vm2, nan, %v561_v5  ;;  %v699_v13 = vmul.f32 %v698_v1, %v696_v26  ;;  %v1840_v12 = vshrl.u32 %v937_v16, 30  ;;  %v703_v7 = vsel %vm618_vm10, %v702_v11, %v1743_v62 }
 0x12d   :  { %566 = vperm.xlu1 %1366, %v562_v4   ;;  %v453_v25 = vsel %vm451_vm11, %v1385_v54, %v452_v42  ;;  %v456_v28 = vsel %vm454_vm13, %v455_v46, %v1387_v14  ;;  %v199_v52 = vsel %vm189_vm12, nan, %v198_v51  ;;  %vm450_vm15 = vcmp.lt.s32.totalorder %v449_v58, 2 }
 0x12e   :  { %v700_v21 = vxor.u32 2147483648, %v699_v13  ;;  %v939_v39 = vshll.u32 %v1840_v12, 30  ;;  %v705_v35 = vsel %vm617_vm14, 0, %v703_v7  ;;  %v457_v19 = vsel %vm450_vm15, %v453_v25, %v456_v28  ;;  %v1101_v28 = vld [vmem:[%s1888_s4] sm:$0xff] }
 0x12f   :  { %v812_v24 = vadd.s32 3, %v705_v35  ;;  %v458_v29 = vsel %vm448_vm2, nan, %v457_v19  ;;  %v709_v10 = vand.u32 3, %v705_v35  ;;  %v1455_v45 = vmov 2  }
 0x130   :  { %v701_v22 = vsel %vm618_vm10, %v700_v21, %v699_v13  ;;  %v940_v23 = vsub.s32 %v936_v3, %v939_v39  ;;  %v932_v18 = vadd.s32 %v1821_v47, %v1807_v0  ;;  %vm708_vm5 = vweird.f32 %v1534_v9 }
 0x131   :  { %1367 = vset.pattern.permute.xlu1 %v1446_v60  ;;  %v704_v15 = vsel %vm617_vm14, %v1534_v9, %v701_v22  ;;  %v813_v31 = vand.u32 3, %v812_v24  ;;  %vm711_vm12 = vcmp.eq.s32.totalorder %v709_v10, 0  ;;  %vm714_vm0 = vcmp.eq.s32.totalorder %v709_v10, 2  ;;  %v1102_v22 = vld [vmem:[%s1888_s4 + $0x8] sm:$0xff] }
 0x132   :  { %317 = vperm.xlu1 %1367, %v199_v52   ;;  %1388 = vcosq.f32 %v704_v15  ;;  %v942_v62 = vsub.s32 0, %v940_v23  ;;  %vm710_vm6 = vcmp.lt.s32.totalorder %v709_v10, 2  ;;  %v962_v17 = vsub.s32 4, %v1840_v12  ;;  %v1295_v10 = vld [vmem:[#allocation4 + $0x2] ss:$0 sm:$0xff] }
 0x133   :  { %1390 = vsinq.f32 %v704_v15  ;;  %vm814_vm3 = vcmp.lt.s32.totalorder %v813_v31, 2  ;;  %vm818_vm4 = vcmp.eq.s32.totalorder %v813_v31, 2  ;;  %vm815_vm2 = vcmp.eq.s32.totalorder %v813_v31, 0 }
 0x134   :  { %v1297_v60 = vmin.u32 %v942_v62, %v940_v23  ;;  %vm878_vm7 = vcmp.lt.s32.totalorder %v1547_v27, 0  ;;  %vm877_vm8 = vcmp.le.f32.partialorder %v876_v37, 0.7853982  ;;  %vm968_vm15 = vweird.f32 %v1547_v27  ;;  %v1286_v62 = vld [vmem:[#allocation4 + $0x1] ss:$0 sm:$0xff] }
 0x135   :  { %v963_v2 = vsel %vm878_vm7, %v962_v17, %v1840_v12  ;;  %v1456_v39 = vmov 0.0|0.0   ;;  %v1329_v52 = vpack.c.bf16 %v1102_v22, %v1101_v28 }
 0x136   :  { %1368 = vset.pattern.permute.xlu1 %v1447_v61  ;;  %v944_v33 = vclz %v1297_v60  ;;  %v965_v1 = vsel %vm877_vm8, 0, %v963_v2  ;;  %1328 = vmatprep.subr.bf16.mxu0 %v1456_v39 }
 0x137   :  { %576 = vperm.xlu1 %1368, %v458_v29   ;;  %v1072_v3 = vadd.s32 3, %v965_v1  ;;  %v969_v6 = vand.u32 3, %v965_v1  ;;  %1331 = vmatprep.subr.bf16.mxu1 %v1456_v39  ;;  %v1277_v29 = vld [vmem:[#allocation4] ss:$0 sm:$0xff] }
 0x138   :  { %v1298_v30 = vadd.s32 4294967294, %v944_v33  ;;  %1330 = vmatpush3.bf16.msra.mxu0 %v1329_v52 }
 0x139   :  { %v1073_v5 = vand.u32 3, %v1072_v3  ;;  %vm971_vm11 = vcmp.eq.s32.totalorder %v969_v6, 0  ;;  %vm974_vm13 = vcmp.eq.s32.totalorder %v969_v6, 2 }
 0x13a   :  { %vm1299_vm1 = vcmp.lt.s32.totalorder %v1298_v30, 0 }
 0x13b   :  { %1369 = vset.pattern.permute.xlu1 %v1455_v45  ;;  %v947_v61 = vsel %vm1299_vm1, 0, %v1298_v30  ;;  %vm1078_vm9 = vcmp.eq.s32.totalorder %v1073_v5, 2  ;;  %vm1075_vm10 = vcmp.eq.s32.totalorder %v1073_v5, 0  ;;  %vm1074_vm14 = vcmp.lt.s32.totalorder %v1073_v5, 2 }
 0x13c   :  { %v1389_v38 = vpop.eup %1388  ;;  %v948_v34 = vsub.s32 32, %v947_v61  ;;  %v952_v32 = vsub.s32 4294967266, %v947_v61  ;;  %v949_v57 = vshll.u32 %v940_v23, %v947_v61  ;;  %vm1103_vm1 = vcmask 130048  }
 0x13d   :  { %v1391_v40 = vpop.eup %1390  ;;  %v715_v43 = vxor.u32 2147483648, %v1389_v38 }
 0x13e   :  { %v712_v44 = vxor.u32 2147483648, %v1391_v40  ;;  %v950_v54 = vshrl.u32 %v932_v18, %v948_v34  ;;  %v953_v36 = vadd.s32 127, %v952_v32 }
 0x13f   :  { %v820_v48 = vsel %vm818_vm4, %v715_v43, %v1391_v40  ;;  %v716_v49 = vsel %vm714_vm0, %v715_v43, %v1391_v40  ;;  %vm1457_vm0 = vmmov 0  }
 0x140   :  { %v817_v50 = vsel %vm815_vm2, %v1389_v38, %v712_v44  ;;  %v713_v53 = vsel %vm711_vm12, %v1389_v38, %v712_v44  ;;  %v951_v14 = vor.u32 %v950_v54, %v949_v57  ;;  %v954_v46 = vshll.u32 %v953_v36, 23  ;;  %v1304_v38 = vld [vmem:[#allocation4 + $0x3] ss:$0 sm:$0xff]  ;;  %v1178_v57 = vld [vmem:[%s1889_s5] sm:$0xff] }
 0x141   :  { %v821_v55 = vsel %vm814_vm3, %v817_v50, %v820_v48  ;;  %v717_v0 = vsel %vm710_vm6, %v713_v53, %v716_v49  ;;  %vm970_vm12 = vcmp.lt.s32.totalorder %v969_v6, 2  ;;  %v1179_v50 = vld [vmem:[%s1889_s5 + $0x8] sm:$0xff]  ;;  %vm1260_vm3 = vcmask 15360  }
 0x142   :  { %v822_v56 = vsel %vm708_vm5, nan, %v821_v55  ;;  %v955_v47 = vor.u32 4788187, %v954_v46  ;;  %v718_v41 = vsel %vm708_vm5, nan, %v717_v0  ;;  %v958_v58 = vcvt.s32.f32 %v951_v14 }
 0x143   :  { %826 = vperm.xlu1 %1369, %v822_v56   ;;  %v1332_v53 = vpack.c.bf16 %v1179_v50, %v1178_v57  ;;  %v1306_v56 = vld [vmem:[%s1890_s6] ss:$0 sm:$0xff] }
 0x144   :  { %v956_v42 = vand.u32 2147483647, %v955_v47 }
 0x145   :  { %1333 = vmatpush3.bf16.msra.mxu1 %v1332_v53 }
 0x146   :  { %v959_v59 = vmul.f32 %v958_v58, %v956_v42 }
 0x147   :  { %836 = vperm.xlu1 %1369, %v718_v41  }
 0x148   :  { %v960_v20 = vxor.u32 2147483648, %v959_v59 }
 0x14a   :  { %v961_v9 = vsel %vm878_vm7, %v960_v20, %v959_v59 }
 0x14b   :  { %1370 = vset.pattern.permute.xlu1 %v1454_v63  ;;  %v964_v26 = vsel %vm877_vm8, %v1547_v27, %v961_v9  ;;  %v1458_v27 = vmov 0.0  }
 0x14c   :  { %1392 = vcosq.f32 %v964_v26  ;;  %1318 = vmatprep.mubr.msk.f32.mxu0 %vm1457_vm0, %v1458_v27  ;;  %1325 = vmatprep.mubr.msk.f32.mxu1 %vm1457_vm0, %v1458_v27 }
 0x14d   :  { %1394 = vsinq.f32 %v964_v26 }
 0x156   :  { %v1393_v8 = vpop.eup %1392 }
 0x157   :  { %v1395_v11 = vpop.eup %1394  ;;  %v975_v4 = vxor.u32 2147483648, %v1393_v8 }
 0x158   :  { %v972_v63 = vxor.u32 2147483648, %v1395_v11 }
 0x159   :  { %v1080_v13 = vsel %vm1078_vm9, %v975_v4, %v1395_v11  ;;  %v976_v51 = vsel %vm974_vm13, %v975_v4, %v1395_v11 }
 0x15a   :  { %v1077_v37 = vsel %vm1075_vm10, %v1393_v8, %v972_v63  ;;  %v973_v16 = vsel %vm971_vm11, %v1393_v8, %v972_v63 }
 0x15b   :  { %v1081_v21 = vsel %vm1074_vm14, %v1077_v37, %v1080_v13  ;;  %v977_v7 = vsel %vm970_vm12, %v973_v16, %v976_v51 }
 0x15c   :  { %v1082_v12 = vsel %vm968_vm15, nan, %v1081_v21  ;;  %v978_v25 = vsel %vm968_vm15, nan, %v977_v7 }
 0x15d   :  { %1086 = vperm.xlu1 %1370, %v1082_v12  }
 0x161   :  { %1096 = vperm.xlu1 %1370, %v978_v25  }
 0x1a3   :  { %v308_v60 = vpop.permute.xlu0 %307 }
 0x1a4   :  { %v314_v31 = vmul.f32 %v1277_v29, %v308_v60 }
 0x1ac   :  { %v567_v15 = vpop.permute.xlu1 %566 }
 0x1ad   :  { %v573_v33 = vmul.f32 %v1286_v62, %v567_v15 }
 0x1b1   :  { %v318_v35 = vpop.permute.xlu1 %317 }
 0x1b2   :  { %v320_v43 = vadd.f32 %v318_v35, %v314_v31 }
 0x1b6   :  { %v577_v23 = vpop.permute.xlu1 %576 }
 0x1b7   :  { %v579_v30 = vadd.f32 %v577_v23, %v573_v33 }
 0x1b9   :  { %v580_v44 = vmul.f32 %v579_v30, %v320_v43 }
 0x1c2   :  { %v827_v19 = vpop.permute.xlu1 %826 }
 0x1c3   :  { %v833_v45 = vmul.f32 %v1295_v10, %v827_v19 }
 0x1c6   :  { %v837_v24 = vpop.permute.xlu1 %836 }
 0x1c7   :  { %v839_v61 = vadd.f32 %v837_v24, %v833_v45 }
 0x1c9   :  { %v840_v32 = vmul.f32 %v839_v61, %v580_v44 }
 0x1dc   :  { %v1087_v40 = vpop.permute.xlu1 %1086 }
 0x1dd   :  { %v1093_v18 = vmul.f32 %v1304_v38, %v1087_v40 }
 0x1e0   :  { %v1097_v34 = vpop.permute.xlu1 %1096 }
 0x1e1   :  { %v1099_v48 = vadd.f32 %v1097_v34, %v1093_v18 }
 0x1e3   :  { %v1100_v49 = vmul.f32 %v1099_v48, %v840_v32 }
 0x1e5   :  { %1319 = vmatmul.mubr.msk.f32.vlgmr.msra.gmra.mrb[0].mxu0 %vm1103_vm1, %v1100_v49 }
 0x2b8   :  { %v1173_v54 = vpop.f32.mrb[0].mxu0 }
 0x2b9   :  { %v1177_v36 = vmul.f32 %v1173_v54, %v1173_v54  ;;  %v1320_v55 = vpop.f32.mrb[1].mxu0 }
 0x2bb   :  { %1326 = vmatmul.mubr.msk.f32.vlgmr.msra.gmra.mrb[0].mxu1 %vm1103_vm1, %v1177_v36 }
 0x38e   :  { %v1256_v14 = vpop.f32.mrb[0].mxu1 }
 0x38f   :  { %v1257_v46 = vadd.f32 %v1306_v56, %v1256_v14  ;;  %v1327_v0 = vpop.f32.mrb[1].mxu1 }
 0x391   :  { %1261 = vst.msk [vmem:[%s1891_s7] sm:$0xff] %vm1260_vm3, %v1257_v46 }
 0x392   :  { %1266 = vsyncpa [#allocation3], 1 }
 0x393   :  { %1267 = vsyncpa [#allocation5], 1 }

</bundles_post_ra>
